<compile_context>
chip_gen: v7x
topology: tpu7x:2x2x1
jax: 0.10.0
libtpu: 0.0.40
codegen_flags: <defaults>
</compile_context>

<pallas_src>
import functools
import math

import jax
import jax.numpy as jnp
from jax.experimental import pallas as pl
from jax.experimental.pallas import tpu as pltpu


def _build_pe_table(d_model: int, max_len: int = 5000) -> jnp.ndarray:
    """Deterministic sinusoidal PE table, same math as the PyTorch __init__ (even d_model)."""
    position = jnp.arange(0, max_len, dtype=jnp.float32)[:, None]            # (max_len, 1)
    div_term = jnp.exp(
        jnp.arange(0, d_model, 2, dtype=jnp.float32) * (-math.log(10000.0) / d_model)
    )                                                                         # (ceil(D/2),)
    angles = position * div_term                                              # (max_len, D/2)
    pe = jnp.zeros((max_len, d_model), dtype=jnp.float32)
    pe = pe.at[:, 0::2].set(jnp.sin(angles))
    pe = pe.at[:, 1::2].set(jnp.cos(angles)[:, : d_model // 2])
    return pe                                                                 # (max_len, D)


def _pe_add_kernel(alpha_ref, x_ref, pe_ref, o_ref):
    # alpha_ref: SMEM (1,) scalar parameter.
    # x_ref / pe_ref / o_ref: identical (rows, lanes) VMEM tiles (batch dim squeezed),
    # so the body is a plain VPU scale-add with no broadcast/relayout.  pe stays in its
    # own dtype; promotion + final cast happen in-register.
    o_ref[...] = (x_ref[...] + alpha_ref[0] * pe_ref[...]).astype(o_ref.dtype)


def _pick_row_tile(rows: int, target_rows: int, align: int) -> int:
    """Largest row tile <= target that is a multiple of `align` (or full extent if tiny)."""
    if rows <= align:
        return rows
    t = min(rows, target_rows)
    t -= t % align
    return max(t, align)


def positional_encoding(
    x: jnp.ndarray,
    alpha: jnp.ndarray,
    pe_table: jnp.ndarray,
    *,
    target_tile_bytes: int = 4 * 1024 * 1024,
) -> jnp.ndarray:
    """x: (B, S, D); alpha: (1,) scalar param; pe_table: (max_len, D)."""
    B, S, D = x.shape
    max_len = pe_table.shape[0]

    x_elt = jnp.dtype(x.dtype).itemsize
    sub_align = 8 * max(1, 4 // x_elt)       # 8 for f32, 16 for bf16, 32 for int8/fp8

    if (S * D) % 128 == 0:
        # Lane-dense layout: flatten the per-batch plane into rows of 128 lanes.
        R, C = (S * D) // 128, 128
        x_in = x.reshape(B, R, C)
        pad_d = None
    else:
        # Lane-pad D up to a multiple of 128 so stores stay unmasked full-lane vsts.
        # TODO(synk): absorb the pad/slice wrapper passes into the kernel if this
        # small-D path ever becomes hot.
        pad_d = (-D) % 128
        C = D + pad_d
        R = S
        x_in = jnp.pad(x, ((0, 0), (0, 0), (0, pad_d)))

    target_rows = max(sub_align, target_tile_bytes // (C * x_elt))
    tile_r = _pick_row_tile(R, target_rows, sub_align)
    # v7x megacore: keep >= 2 chunks on the "parallel" row axis when the shape allows it.
    if pl.cdiv(R, tile_r) < 2 and R >= 2 * sub_align:
        tile_r = pl.cdiv(pl.cdiv(R, 2), sub_align) * sub_align

    # pe operand: pass the full table (free row-major reshape, no per-call HBM pass)
    # whenever the block shape stays tile-legal against it; otherwise slice to S rows.
    if pad_d is None and (max_len * D) % 128 == 0 and tile_r % 8 == 0:
        pe_in = pe_table.reshape((max_len * D) // 128, 128)
    elif pad_d is None:
        pe_in = pe_table[:S, :].reshape(R, C)
    else:
        pe_in = jnp.pad(pe_table[:S, :], ((0, 0), (0, pad_d)))

    grid = (pl.cdiv(R, tile_r), B)           # batch innermost -> pe DMA skipped over batch

    pe_elt = jnp.dtype(pe_in.dtype).itemsize
    # Double-buffered x-in + out + pe-in tiles plus slack; never request all of v7x's
    # 64 MiB physical VMEM.
    vmem_need = 2 * tile_r * C * (2 * x_elt + pe_elt) + (4 << 20)
    vmem_limit = int(min(48 << 20, max(vmem_need, 16 << 20)))

    out = pl.pallas_call(
        _pe_add_kernel,
        out_shape=jax.ShapeDtypeStruct((B, R, C), x.dtype),
        grid=grid,
        in_specs=[
            pl.BlockSpec(memory_space=pltpu.MemorySpace.SMEM),                 # alpha
            pl.BlockSpec((pl.Squeezed(), tile_r, C), lambda r, b: (b, r, 0)),  # x tile
            pl.BlockSpec((tile_r, C), lambda r, b: (r, 0)),                    # pe tile (b-invariant)
        ],
        out_specs=pl.BlockSpec((pl.Squeezed(), tile_r, C), lambda r, b: (b, r, 0)),
        input_output_aliases={1: 0},   # donate x's buffer to the output (x += alpha*pe)
        compiler_params=pltpu.CompilerParams(
            dimension_semantics=("parallel", "arbitrary"),
            vmem_limit_bytes=vmem_limit,
        ),
    )(alpha, x_in, pe_in)

    if pad_d is None:
        return out.reshape(B, S, D)
    return out[:, :, :D]


if __name__ == "__main__":
    key = jax.random.PRNGKey(0)

    # Primary check — mirrors the PyTorch module at a small shape (sliced-pe path).
    B, S, D = 2, 8, 32
    x = jax.random.normal(key, (B, S, D), dtype=jnp.float32)
    alpha = jnp.ones((1,), dtype=jnp.float32)            # nn.Parameter(torch.ones(1))
    pe_table = _build_pe_table(D, max_len=5000)          # registered buffer 'pe'
    ref = x + alpha[0] * pe_table[None, :S, :]
    out = jax.block_until_ready(jax.jit(positional_encoding)(x, alpha, pe_table))
    assert out.shape == (B, S, D)
    assert jnp.allclose(out, ref, atol=1e-6, rtol=1e-6)

    # Secondary check — multi-tile (row, batch) grid on the full-table lane-dense path.
    B2, S2, D2 = 2, 64, 128
    x2 = jax.random.normal(jax.random.PRNGKey(1), (B2, S2, D2), dtype=jnp.float32)
    pe2 = _build_pe_table(D2, max_len=256)
    a2 = jnp.full((1,), 0.5, dtype=jnp.float32)
    ref2 = x2 + a2[0] * pe2[None, :S2, :]
    small_tile_fn = jax.jit(
        functools.partial(positional_encoding, target_tile_bytes=8 * 128 * 4)  # tile_r=8 -> grid (8, 2)
    )
    out2 = jax.block_until_ready(small_tile_fn(x2, a2, pe2))
    assert jnp.allclose(out2, ref2, atol=1e-6, rtol=1e-6)

    # Tertiary check — non-128-divisible D exercises the lane-padded path.
    B3, S3, D3 = 2, 5, 24
    x3 = jax.random.normal(jax.random.PRNGKey(2), (B3, S3, D3), dtype=jnp.float32)
    pe3 = _build_pe_table(D3, max_len=16)
    a3 = jnp.full((1,), 2.0, dtype=jnp.float32)
    ref3 = x3 + a3[0] * pe3[None, :S3, :]
    out3 = jax.block_until_ready(jax.jit(positional_encoding)(x3, a3, pe3))
    assert jnp.allclose(out3, ref3, atol=1e-6, rtol=1e-6)

    # Quaternary check — non-divisible row count (partial last block) with the
    # lane-flattened layout, full-table pe, and input/output aliasing.
    B4, S4, D4 = 3, 20, 128                               # R=20, default tile_r=16 -> partial block
    x4 = jax.random.normal(jax.random.PRNGKey(3), (B4, S4, D4), dtype=jnp.float32)
    pe4 = _build_pe_table(D4, max_len=64)
    a4 = jnp.full((1,), 1.5, dtype=jnp.float32)
    ref4 = x4 + a4[0] * pe4[None, :S4, :]
    out4 = jax.block_until_ready(jax.jit(positional_encoding)(x4, a4, pe4))
    assert jnp.allclose(out4, ref4, atol=1e-6, rtol=1e-6)

    print("KERNEL_OK")
</pallas_src>

<mosaic_0001>
module attributes {stable_mosaic.version = 11 : i64} {
  func.func @_pe_add_kernel(%arg0: i32, %arg1: i32, %arg2: memref<1xf32, #tpu.memory_space<smem>>, %arg3: memref<1x2x128xf32, #tpu.memory_space<vmem>>, %arg4: memref<2x128xf32, #tpu.memory_space<vmem>>, %arg5: memref<1x2x128xf32, #tpu.memory_space<vmem>>) attributes {dimension_semantics = [#tpu.dimension_semantics<parallel>, #tpu.dimension_semantics<arbitrary>], iteration_bounds = array<i64: 1, 2>, scalar_prefetch = 0 : i64, scratch_operands = 0 : i64, tpu.core_type = #tpu.core_type<tc>, window_params = [{transform_indices = @transform_0, window_bounds = array<i64: 1>}, {transform_indices = @transform_1, window_bounds = array<i64: 1, 2, 128>}, {transform_indices = @transform_2, window_bounds = array<i64: 2, 128>}, {transform_indices = @transform_3, window_bounds = array<i64: 1, 2, 128>}]} {
    %c0 = arith.constant 0 : index
    %c0_0 = arith.constant 0 : index
    %c0_1 = arith.constant 0 : index
    %0 = vector.load %arg3[%c0, %c0_0, %c0_1] : memref<1x2x128xf32, #tpu.memory_space<vmem>>, vector<1x2x128xf32>
    %1 = vector.shape_cast %0 : vector<1x2x128xf32> to vector<2x128xf32>
    %c0_2 = arith.constant 0 : index
    %2 = memref.load %arg2[%c0_2] : memref<1xf32, #tpu.memory_space<smem>>
    %c0_3 = arith.constant 0 : index
    %c0_4 = arith.constant 0 : index
    %3 = vector.load %arg4[%c0_3, %c0_4] : memref<2x128xf32, #tpu.memory_space<vmem>>, vector<2x128xf32>
    %4 = vector.broadcast %2 : f32 to vector<2x128xf32>
    %5 = arith.mulf %4, %3 : vector<2x128xf32>
    %6 = arith.addf %1, %5 : vector<2x128xf32>
    %c0_5 = arith.constant 0 : index
    %c0_6 = arith.constant 0 : index
    %c0_7 = arith.constant 0 : index
    %7 = vector.load %arg5[%c0_5, %c0_6, %c0_7] : memref<1x2x128xf32, #tpu.memory_space<vmem>>, vector<1x2x128xf32>
    %8 = vector.shape_cast %7 : vector<1x2x128xf32> to vector<2x128xf32>
    %9 = vector.shape_cast %6 : vector<2x128xf32> to vector<1x2x128xf32>
    tpu.vector_store %arg5[%c0_5, %c0_6, %c0_7], %9 {strides = array<i32>} : memref<1x2x128xf32, #tpu.memory_space<vmem>>, vector<1x2x128xf32>,
    return
  }
  func.func @transform_0(%arg0: i32, %arg1: i32) -> i32 {
    %c0_i32 = arith.constant 0 : i32
    %c0_i32_0 = arith.constant 0 : i32
    return %c0_i32 : i32
  }
  func.func @transform_1(%arg0: i32, %arg1: i32) -> (i32, i32, i32) {
    %c0_i32 = arith.constant 0 : i32
    %c0_i32_0 = arith.constant 0 : i32
    return %arg1, %arg0, %c0_i32 : i32, i32, i32
  }
  func.func @transform_2(%arg0: i32, %arg1: i32) -> (i32, i32) {
    %c0_i32 = arith.constant 0 : i32
    %c0_i32_0 = arith.constant 0 : i32
    return %arg0, %c0_i32 : i32, i32
  }
  func.func @transform_3(%arg0: i32, %arg1: i32) -> (i32, i32, i32) {
    %c0_i32 = arith.constant 0 : i32
    %c0_i32_0 = arith.constant 0 : i32
    return %arg1, %arg0, %c0_i32 : i32, i32, i32
  }
}

</mosaic_0001>

<bundles_post_ra>
// kernel: positional_encoding.1
= control target key start
LH: loop header
LB: loop body
LE: loop exit
PB: predicated region body
PF: predicated region fallthrough
CT: control target
= control target key end

     0   :  { %s393_s14 = smov 0   ;;  %s395_s15 = smov 0   ;;  %s417_s0 = inlined_call_operand.<no memory space> [shape: f32[1], index: 0, kind: input, shape index: {}]   ;;  %s418_s1 = inlined_call_operand.vmem [shape: f32[2,2,128], index: 1, kind: input, shape index: {}, may-alias: {1,3}]   ;;  %s419_s2 = inlined_call_operand.vmem [shape: f32[2,128], index: 2, kind: input, shape index: {}]   ;;  %s420_s3 = inlined_call_operand.vmem [shape: f32[2,2,128], index: 3, kind: output, shape index: {}, may-alias: {1,3}]  }
   0x1   :  { %8 = sst [smem:[#allocation2]] %s417_s0  ;;  %s397_s16 = smov 0  }
   0x2 LB: > { %s23_s17 = sadd.s32 1, %s364_s15  ;;  %p317_p0 = scmp.ge.s32.totalorder %s368_s16, 1  ;;  %s368_s16 = sphi %s397_s16, %s14_s16   ;;  %s364_s15 = sphi %s395_s15, %s422_s15   ;;  %s360_s14 = sphi %s393_s14, %s421_s14  }
   0x3   : > { %p24_p1 = scmp.ge.s32.totalorder %s23_s17, 2  ;;  %p165_p2 = scmp.lt.s32.totalorder %s368_s16, 3 }
   0x5   : > { %s424_s17 = smov (%p24_p1, %s23_s17), 0  ;;  %p166_p3 = pnand %p317_p0, %p165_p2 }
   0x6   : > { %p197_p4 = scmp.lt.s32.totalorder (!%p166_p3), %s360_s14, 1  ;;  %s216_s0 = sld [smem:[#allocation2]] (!%p166_p3)  ;;  %v217_v0 = vld [vmem:[%s419_s2] sm:$0x3] (!%p166_p3) }
   0x7   : > { %169 = sbr.rel (%p166_p3) target bundleno = 21 (0x15), region = 32 }
   0xc   : > { %v218_v2 = vstv (!%p166_p3), %s216_s0 }
   0xd   : > { %v219_v3 = vmul.f32 (!%p166_p3), %v218_v2, %v217_v0 }
   0xe   : > { %s426_s14 = smov (!%p197_p4, %s360_s14), 1 }
   0xf   : > { %s318_s18 = sshll.u32 %s426_s14, 1 }
  0x10   : > { %s203_s23 = scalar_lea.vmem %s418_s1, %s318_s18  ;;  %s214_s26 = scalar_lea.vmem %s420_s3, %s318_s18 }
  0x11   : > { %v215_v1 = vld [vmem:[%s203_s23] sm:$0x3] }
  0x12   : > { %v220_v4 = vadd.f32 %v219_v3, %v215_v1 }
  0x14   : > { %221 = vst [vmem:[%s214_s26] sm:$0x3] %v220_v4 }
  0x15 PF: > { %s14_s16 = sadd.s32 1, %s368_s16   ;;  %s421_s14 = smov %s364_s15 }
  0x16   : > { %p11_p5 = scmp.ge.s32.totalorder %s14_s16, 4   ;;  %s422_s15 = smov %s424_s17 }
  0x18   :  { %13 = sbr.rel (!%p11_p5) target bundleno = 2 (0x2), region = 65 }

</bundles_post_ra>
